<compile_context>
chip_gen: v6e
topology: v6e:2x2x1
jax: 0.10.0
libtpu: 0.0.40
codegen_flags: <defaults>
</compile_context>

<pallas_src>
import math

import jax
import jax.numpy as jnp
from jax.experimental import pallas as pl
from jax.experimental.pallas import tpu as pltpu

_LANE = 128
_TARGET_BLOCK_BYTES = 4 * 1024 * 1024   # ~4 MiB blocks: >=85-90% HBM roofline on all gens
_VMEM_LIMIT_BYTES = 32 * 1024 * 1024    # covers v5e's 16 MiB scoped default


def _sublane(dtype):
    # native sublane tile: 8 for 4-byte, 16 for 2-byte, 32 for 1-byte dtypes
    return max(8, 32 // jnp.dtype(dtype).itemsize)


def _round_up(a, b):
    return -(-a // b) * b


def _round_down(a, b):
    return (a // b) * b


# -----------------------------------------------------------------------------
# Kernel: one broadcasted multiply. scale is f32 -> product computed in f32 and
# cast once (bf16-safe), regardless of the activation dtype.
# -----------------------------------------------------------------------------
def _drop_path_kernel(x_ref, scale_ref, o_ref):
    o_ref[...] = (x_ref[...] * scale_ref[...]).astype(o_ref.dtype)


# -----------------------------------------------------------------------------
# Path A: per-sample row blocks over a (n, rows, 128) view.
# Used when per_sample % 128 == 0 and the batch is smaller than one sublane
# tile (so batching samples into sublanes would waste layout/VMEM).
# -----------------------------------------------------------------------------
def _apply_per_sample_grid(x, scale):
    n = x.shape[0]
    per_sample = math.prod(x.shape[1:]) if x.ndim > 1 else 1
    rows = per_sample // _LANE
    sub = _sublane(x.dtype)
    item = jnp.dtype(x.dtype).itemsize

    br = max(sub, _round_down(_TARGET_BLOCK_BYTES // (_LANE * item), sub))
    if rows <= br:
        br = rows
        # batch==1 with a big sample: split rows so both v7x cores get work
        if n == 1 and rows >= 2 * sub:
            br = _round_up(-(-rows // 2), sub)

    x3 = x.reshape(n, rows, _LANE)        # free reshape (contiguous)
    s3 = scale.reshape(n, 1, 1)

    out = pl.pallas_call(
        _drop_path_kernel,
        out_shape=jax.ShapeDtypeStruct((n, rows, _LANE), x.dtype),
        grid=(n, pl.cdiv(rows, br)),
        in_specs=[pl.BlockSpec((1, br, _LANE), lambda b, r: (b, r, 0)),
                  pl.BlockSpec((1, 1, 1), lambda b, r: (b, 0, 0))],
        out_specs=pl.BlockSpec((1, br, _LANE), lambda b, r: (b, r, 0)),
        compiler_params=pltpu.CompilerParams(
            dimension_semantics=("parallel", "parallel"),
            vmem_limit_bytes=_VMEM_LIMIT_BYTES),
    )(x3, s3)
    return out.reshape(x.shape)


# -----------------------------------------------------------------------------
# Path B: (n, per_sample) view; batch -> sublanes, features -> lanes.
# Handles ragged per-sample sizes (no wrapper pad / output slice) and
# small-per-sample / large-batch shapes with byte-targeted blocks.
# -----------------------------------------------------------------------------
def _apply_batch_in_sublanes(x, scale):
    n = x.shape[0]
    per_sample = math.prod(x.shape[1:]) if x.ndim > 1 else 1
    sub = _sublane(x.dtype)
    item = jnp.dtype(x.dtype).itemsize
    lane_pad = _round_up(per_sample, _LANE)   # VMEM lane padding of a full-lane block

    bn = n if n < sub else sub
    if _round_up(bn, sub) * lane_pad * item <= _TARGET_BLOCK_BYTES:
        # full lane extent per block; grow the batch tile toward the byte target
        tc = per_sample
        if n > sub:
            bn = min(_round_down(n, sub),
                     max(sub, _round_down(_TARGET_BLOCK_BYTES // (lane_pad * item), sub)))
    else:
        # huge per-sample size: tile the lane dim in multiples of 128
        # TODO(synk): for n < sub this block carries up to sub/n VMEM padding.
        tc = max(_LANE,
                 _round_down(_TARGET_BLOCK_BYTES // (_round_up(bn, sub) * item), _LANE))
        tc = min(tc, _round_down(per_sample, _LANE))

    # keep >=2 grid steps for v7x megacore when there is enough work
    if (pl.cdiv(n, bn) * pl.cdiv(per_sample, tc) == 1
            and n * per_sample * item >= (1 << 19)):
        if n >= 2 * sub:
            bn = _round_up(-(-n // 2), sub)
        elif per_sample >= 2 * _LANE:
            tc = _round_up(-(-per_sample // 2), _LANE)

    x2 = x.reshape(n, per_sample)          # free reshape (contiguous)
    s2 = scale.reshape(n, 1)

    out = pl.pallas_call(
        _drop_path_kernel,
        out_shape=jax.ShapeDtypeStruct((n, per_sample), x.dtype),
        grid=(pl.cdiv(n, bn), pl.cdiv(per_sample, tc)),
        in_specs=[pl.BlockSpec((bn, tc), lambda i, j: (i, j)),
                  pl.BlockSpec((bn, 1), lambda i, j: (i, 0))],
        out_specs=pl.BlockSpec((bn, tc), lambda i, j: (i, j)),
        compiler_params=pltpu.CompilerParams(
            dimension_semantics=("parallel", "parallel"),
            vmem_limit_bytes=_VMEM_LIMIT_BYTES),
    )(x2, s2)
    return out.reshape(x.shape)


def _drop_path_apply(x, scale):
    n = x.shape[0]
    per_sample = math.prod(x.shape[1:]) if x.ndim > 1 else 1
    if per_sample % _LANE == 0 and n < _sublane(x.dtype):
        return _apply_per_sample_grid(x, scale)
    return _apply_batch_in_sublanes(x, scale)


# -----------------------------------------------------------------------------
# Public API (mirrors drop_path_f / DropPath)
# -----------------------------------------------------------------------------
def drop_path(x, drop_prob=0.0, *, key=None, training=False):
    if drop_prob == 0.0 or not training:
        return x                           # identity fast path (as PyTorch)
    if key is None:
        raise ValueError("drop_path in training mode needs a PRNG key")
    keep_prob = 1.0 - float(drop_prob)
    u = jax.random.uniform(key, (x.shape[0],), dtype=jnp.float32)
    # per-sample scale in f32: keep/keep_prob in {0, 1/keep_prob}
    scale = (jnp.floor(keep_prob + u) * (1.0 / keep_prob)).astype(jnp.float32)
    return _drop_path_apply(x, scale)


class DropPath:
    """Drop paths (Stochastic Depth) per sample."""

    def __init__(self, drop_prob=None):
        self.drop_prob = float(drop_prob or 0.0)
        self.training = True

    def __call__(self, x, *, key=None):
        return drop_path(x, self.drop_prob, key=key, training=self.training)


# -----------------------------------------------------------------------------
# Pure-JAX reference (literal translation of drop_path_f; same key => same mask)
# -----------------------------------------------------------------------------
def drop_path_ref(x, drop_prob=0.0, *, key=None, training=False):
    if drop_prob == 0.0 or not training:
        return x
    keep_prob = 1.0 - float(drop_prob)
    u = jax.random.uniform(key, (x.shape[0],), dtype=jnp.float32)
    random_tensor = jnp.floor(keep_prob + u).astype(x.dtype)
    random_tensor = random_tensor.reshape((x.shape[0],) + (1,) * (x.ndim - 1))
    return x / keep_prob * random_tensor


if __name__ == "__main__":
    root = jax.random.PRNGKey(0)
    k_x, k_d, k_x2, k_d2, k_x3, k_d3, k_d4 = jax.random.split(root, 7)

    # 1) canonical conv-activation shape (N, C, H, W) -> per-sample row-block path
    x = jax.random.normal(k_x, (2, 4, 16, 16), jnp.float32)
    out = jax.block_until_ready(drop_path(x, 0.25, key=k_d, training=True))
    ref = drop_path_ref(x, 0.25, key=k_d, training=True)
    assert out.shape == x.shape
    assert jnp.allclose(out, ref, atol=1e-6, rtol=1e-6), float(jnp.max(jnp.abs(out - ref)))

    # 2) identity fast paths (eval mode / drop_prob == 0)
    assert jnp.array_equal(drop_path(x, 0.25, key=k_d, training=False), x)
    assert jnp.array_equal(drop_path(x, 0.0, key=k_d, training=True), x)

    # 3) ragged per-sample size (315 elems) -> batch-in-sublanes path, no pad/slice
    x2 = jax.random.normal(k_x2, (3, 5, 7, 9), jnp.float32)
    out2 = jax.block_until_ready(drop_path(x2, 0.5, key=k_d2, training=True))
    ref2 = drop_path_ref(x2, 0.5, key=k_d2, training=True)
    assert jnp.allclose(out2, ref2, atol=1e-6, rtol=1e-6), float(jnp.max(jnp.abs(out2 - ref2)))

    # 4) larger batch, aligned per-sample -> batch-in-sublanes path (n >= 8)
    x3 = jax.random.normal(k_x3, (16, 32, 8, 8), jnp.float32)
    out3 = jax.block_until_ready(drop_path(x3, 0.3, key=k_d3, training=True))
    ref3 = drop_path_ref(x3, 0.3, key=k_d3, training=True)
    assert jnp.allclose(out3, ref3, atol=1e-6, rtol=1e-6), float(jnp.max(jnp.abs(out3 - ref3)))

    # 5) bf16 activations: scale kept in f32 inside the kernel, cast once
    xb = x.astype(jnp.bfloat16)
    outb = jax.block_until_ready(drop_path(xb, 0.25, key=k_d4, training=True))
    refb = drop_path_ref(xb.astype(jnp.float32), 0.25, key=k_d4,
                         training=True).astype(jnp.bfloat16)
    assert jnp.allclose(outb.astype(jnp.float32), refb.astype(jnp.float32),
                        atol=2e-2, rtol=2e-2)

    print("KERNEL_OK")
</pallas_src>

<mosaic_0001>
module attributes {stable_mosaic.version = 11 : i64} {
  func.func @_drop_path_kernel(%arg0: i32, %arg1: i32, %arg2: memref<1x8x128xf32, #tpu.memory_space<vmem>>, %arg3: memref<1x1x1xf32, #tpu.memory_space<vmem>>, %arg4: memref<1x8x128xf32, #tpu.memory_space<vmem>>) attributes {dimension_semantics = [#tpu.dimension_semantics<parallel>, #tpu.dimension_semantics<parallel>], iteration_bounds = array<i64: 2, 1>, scalar_prefetch = 0 : i64, scratch_operands = 0 : i64, tpu.core_type = #tpu.core_type<tc>, window_params = [{transform_indices = @transform_0, window_bounds = array<i64: 1, 8, 128>}, {transform_indices = @transform_1, window_bounds = array<i64: 1, 1, 1>}, {transform_indices = @transform_2, window_bounds = array<i64: 1, 8, 128>}]} {
    %c0 = arith.constant 0 : index
    %c0_0 = arith.constant 0 : index
    %c0_1 = arith.constant 0 : index
    %0 = vector.load %arg2[%c0, %c0_0, %c0_1] : memref<1x8x128xf32, #tpu.memory_space<vmem>>, vector<1x8x128xf32>
    %c0_2 = arith.constant 0 : index
    %c0_3 = arith.constant 0 : index
    %c0_4 = arith.constant 0 : index
    %1 = vector.load %arg3[%c0_2, %c0_3, %c0_4] : memref<1x1x1xf32, #tpu.memory_space<vmem>>, vector<1x1x1xf32>
    %2 = vector.broadcast %1 : vector<1x1x1xf32> to vector<1x8x128xf32>
    %3 = arith.mulf %0, %2 : vector<1x8x128xf32>
    %c0_5 = arith.constant 0 : index
    %c0_6 = arith.constant 0 : index
    %c0_7 = arith.constant 0 : index
    %4 = vector.load %arg4[%c0_5, %c0_6, %c0_7] : memref<1x8x128xf32, #tpu.memory_space<vmem>>, vector<1x8x128xf32>
    tpu.vector_store %arg4[%c0_5, %c0_6, %c0_7], %3 {strides = array<i32>} : memref<1x8x128xf32, #tpu.memory_space<vmem>>, vector<1x8x128xf32>,
    return
  }
  func.func @transform_0(%arg0: i32, %arg1: i32) -> (i32, i32, i32) {
    %c0_i32 = arith.constant 0 : i32
    %c0_i32_0 = arith.constant 0 : i32
    return %arg0, %arg1, %c0_i32 : i32, i32, i32
  }
  func.func @transform_1(%arg0: i32, %arg1: i32) -> (i32, i32, i32) {
    %c0_i32 = arith.constant 0 : i32
    %c0_i32_0 = arith.constant 0 : i32
    %c0_i32_1 = arith.constant 0 : i32
    return %arg0, %c0_i32, %c0_i32_0 : i32, i32, i32
  }
  func.func @transform_2(%arg0: i32, %arg1: i32) -> (i32, i32, i32) {
    %c0_i32 = arith.constant 0 : i32
    %c0_i32_0 = arith.constant 0 : i32
    return %arg0, %arg1, %c0_i32 : i32, i32, i32
  }
}

</mosaic_0001>

<bundles_post_ra>
// kernel: tpu_custom_call.1
= control target key start
LH: loop header
LB: loop body
LE: loop exit
PB: predicated region body
PF: predicated region fallthrough
CT: control target
= control target key end

     0   :  { %7 = vsyncpa [#allocation3], 0  ;;  %s652_s0 = inlined_call_operand.hbm [shape: f32[2,8,128], index: 0, kind: input, shape index: {}]   ;;  %s653_s1 = inlined_call_operand.vmem [shape: f32[2,1,1], index: 1, kind: input, shape index: {}]   ;;  %s654_s2 = inlined_call_operand.hbm [shape: f32[2,8,128], index: 2, kind: output, shape index: {}]  }
   0x1   :  { %9 = vsyncpa [#allocation3 + $0x1], 0 }
   0x2   :  { %10 = vsyncpa [#allocation4], 0 }
   0x3   :  { %12 = vsyncpa [#allocation4 + $0x1], 0  ;;  %s513_s9 = smov 0   ;;  %s515_s10 = smov 0  }
   0x4   :  { %s517_s11 = smov 0   ;;  %s519_s12 = smov 0  }
   0x5   :  { %s521_s13 = smov 0   ;;  %s523_s14 = smov 0  }
   0x6 LB: > { %s307_s15 = sadd.s32 4294967295, %s493_s14   ;;  %s308_s16 = sadd.s32 4294967294, %s493_s14   ;;  %s493_s14 = sphi %s523_s14, %s18_s14   ;;  %s489_s13 = sphi %s521_s13, %s666_s13   ;;  %s485_s12 = sphi %s519_s12, %s665_s12   ;;  %s481_s11 = sphi %s517_s11, %s664_s11   ;;  %s477_s10 = sphi %s515_s10, %s663_s10   ;;  %s473_s9 = sphi %s513_s9, %s662_s9  }
   0x7   : > { %s30_s17 = sadd.s32 1, %s489_s13  ;;  %s39_s18 = sadd.s32 1, %s481_s11 }
   0x8   : > { %p32_p0 = scmp.ge.s32.totalorder %s30_s17, 2  ;;  %p46_p1 = scmp.ne.s32.totalorder %s481_s11, %s477_s10 }
   0x9   : > { %p47_p2 = scmp.eq.s32.totalorder %s493_s14, 0  ;;  %p52_p3 = scmp.ne.s32.totalorder %s477_s10, %s473_s9 }
   0xa   : > { %s668_s17 = smov (%p32_p0, %s30_s17), 0  ;;  %p53_p5 = scmp.eq.s32.totalorder %s307_s15, 0 }
   0xb   : > { %p554_p4 = por %p47_p2, %p46_p1  ;;  %s34_s20 = ssub.s32 %s489_s13, %s668_s17 }
   0xc   : > { %p104_p6 = scmp.eq.s32.totalorder %s307_s15, 1  ;;  %p37_p7 = scmp.eq.s32.totalorder %s34_s20, 0 }
   0xd   : > { %p560_p8 = por %p53_p5, %p52_p3  ;;  %p110_p10 = scmp.eq.s32.totalorder %s308_s16, 1 }
   0xe   : > { %p564_p9 = por %p104_p6, %p46_p1  ;;  %p333_p13 = scmp.lt.s32.totalorder %s493_s14, 2 }
   0xf   : > { %s569_s23 = scalar_select %p37_p7, %s481_s11, %s39_s18  }
  0x10   : > { %p571_p11 = por %p110_p10, %p52_p3  ;;  %s130_s25 = sand.u32 1, %s481_s11  }
  0x11   : > { %s311_s26 = sshll.u32 %s130_s25, 3  ;;  %s312_s27 = sshll.u32 %s489_s13, 7 }
  0x12   : > { %s658_s24 = scalar_select %p571_p11, 1, 0 }
  0x13   : > { %s140_s30 = scalar_lea.hbm %s652_s0, %s312_s27  ;;  %s134_s3 = scalar_lea.vmem [#allocation2], %s311_s26 }
  0x14   : > { %s142_s4 = sshll.u32 %s134_s3, 4  ;;  %p584_p0 = pnand %p333_p13, %p554_p4  ;;  %s143_s4 = int_to_ptr.vmem [resolvable:$true] %s142_s4 }
  0x15   : > { %p313_p1 = scmp.ge.s32.totalorder %s493_s14, 1  ;;  %p153_p2 = scmp.lt.s32.totalorder %s493_s14, 3 }
  0x16   : > { %s131_s6 = scalar_lea.sflag [#allocation3], %s130_s25  ;;  %p387_p3 = pneg %p584_p0 }
  0x17   : > { %s398_s7 = scalar_lea.vmem %s143_s4, 128  ;;  %s495_s8 = smov [#allocation2]  }
  0x18   : > { %p399_p5 = scmp.ne.s32.totalorder %s143_s4, %s398_s7  ;;  %s403_s15 = sshll.u32 %s495_s8, 4  ;;  %s404_s15 = int_to_ptr.vmem [resolvable:$false] %s403_s15 }
  0x19   : > { %s405_s16 = scalar_lea.vmem %s404_s15, 256  ;;  %p406_p10 = scmp.lt.s32.totalorder %s143_s4, %s404_s15 }
  0x1a   : > { %p401_p6 = pnand %p399_p5, %p387_p3  ;;  %p407_p12 = scmp.lt.s32.totalorder %s405_s16, %s398_s7 }
  0x1c   : > { %p402_p7 = pneg %p401_p6  ;;  %p408_p4 = por %p407_p12, %p406_p10 }
  0x1e   : > { %p409_p13 = pnand %p408_p4, %p402_p7 }
  0x20   : > { %412 = shalt.err (!%p409_p13)
}
  0x21   : > { %328 = dma.hbm_to_vmem [thread:$0]  (!%p584_p0), %s140_s30, 128, %s143_s4, %s131_s6  }
  0x22   : > { %p154_p11 = pnand %p313_p1, %p153_p2 }
  0x23   : > { %s599_s18 = sand.u32 (!%p154_p11), 1, %s477_s10  }
  0x24   : > { %157 = sbr.rel (%p154_p11) target bundleno = 187 (0xbb), region = 28  ;;  %s314_s19 = sshll.u32 (!%p154_p11), %s599_s18, 3 }
  0x25   : > { %s160_s20 = scalar_lea.sflag (!%p154_p11), [#allocation3], %s599_s18  ;;  %s163_s25 = scalar_lea.vmem (!%p154_p11), [#allocation2], %s314_s19 }
  0x29   : > { %464 = dma.done.wait (%p560_p8), %s160_s20, 128  }
  0x2a   : > { %466 = vsyncadd (%p560_p8), %s160_s20, 4294967168  ;;  %p187_p12 = scmp.lt.s32.totalorder %s485_s12, 1  ;;  %v496_v0 = vmov 0   ;;  %v190_v2 = vld [vmem:[%s163_s25] sm:$0xff]  ;;  %s318_s30 = sshll.u32 %s485_s12, 7 }
  0x2b   : > { %384 = vset.pattern.permute.xlu0 %v496_v0  ;;  %s186_s3 = scalar_lea.vmem [#allocation5], %s314_s19  ;;  %s216_s6 = scalar_lea.hbm %s654_s2, %s318_s30 }
  0x2c   : > { %s188_s26 = scalar_select %p187_p12, %s485_s12, 1 }
  0x2d   : > { %s218_s21 = sshll.u32 %s186_s3, 4  ;;  %s204_s7 = scalar_lea.sflag [#allocation4], %s599_s18  ;;  %s219_s21 = int_to_ptr.vmem [resolvable:$true] %s218_s21 }
  0x2e   : > { %s189_s29 = scalar_lea.vmem %s653_s1, %s188_s26  ;;  %s413_s8 = scalar_lea.vmem %s219_s21, 128 }
  0x2f   : > { %v316_v1 = vld [vmem:[%s189_s29] ss:$0 sm:$0xff]  ;;  %p414_p8 = scmp.ne.s32.totalorder %s219_s21, %s413_s8  ;;  %s497_s15 = smov [#allocation5]  }
  0x30   : > { %198 = vperm.xlu0 %384, %v316_v1   ;;  %s417_s16 = sshll.u32 %s497_s15, 4  ;;  %s418_s16 = int_to_ptr.vmem [resolvable:$false] %s417_s16 }
  0x31   : > { %p415_p11 = pnand %p414_p8, %p564_p9  ;;  %s419_s12 = scalar_lea.vmem %s418_s16, 256 }
  0x32   : > { %p420_p1 = scmp.lt.s32.totalorder %s219_s21, %s418_s16  ;;  %p421_p2 = scmp.lt.s32.totalorder %s419_s12, %s413_s8 }
  0x33   : > { %p416_p0 = pneg %p415_p11 }
  0x34   : > { %p422_p3 = por %p421_p2, %p420_p1 }
  0x36   : > { %p423_p5 = pnand %p422_p3, %p416_p0 }
  0xab   : > { %v199_v3 = vpop.permute.xlu0 %198 }
  0xac   : > { %v201_v4 = vmul.f32 %v199_v3, %v190_v2 }
  0xae   : > { %202 = vst [vmem:[%s186_s3] sm:$0xff] %v201_v4 }
  0xaf   : > { %426 = shalt.err (!%p423_p5)
}
  0xb0   : > { %s427_s19 = scalar_lea.hbm %s216_s6, 128  ;;  %s431_s25 = scalar_lea.hbm %s654_s2, 256 }
  0xb1   : > { %p428_p6 = scmp.ne.s32.totalorder %s216_s6, %s427_s19  ;;  %p432_p4 = scmp.lt.s32.totalorder %s216_s6, %s654_s2 }
  0xb2   : > { %p433_p13 = scmp.lt.s32.totalorder %s431_s25, %s427_s19 }
  0xb3   : > { %p429_p7 = pnand %p428_p6, %p564_p9 }
  0xb4   : > { %p434_p12 = por %p433_p13, %p432_p4 }
  0xb5   : > { %p430_p10 = pneg %p429_p7 }
  0xb7   : > { %p435_p8 = pnand %p434_p12, %p430_p10 }
  0xb9   : > { %438 = shalt.err (!%p435_p8)
}
  0xba   : > { %323 = dma.vmem_to_hbm [thread:$0]  (%p564_p9), %s219_s21, 128, %s216_s6, %s204_s7  }
  0xbb PF: > { %s230_s28 = sand.u32 1, %s473_s9   ;;  %p660_p11 = scmp.ne.s32.totalorder %s658_s24, 0 }
  0xbc   : > { %p661_p0 = scmp.ge.s32.totalorder %s493_s14, 2  ;;  %s231_s29 = scalar_lea.sflag [#allocation4], %s230_s28 }
  0xbe   : > { %p330_p1 = pnand %p661_p0, %p660_p11 }
  0xc0   : > { %p331_p2 = pneg %p330_p1 }
  0xc2   : > { %468 = dma.done.wait (%p331_p2), %s231_s29, 128  }
  0xc3   : > { %470 = vsyncadd (%p331_p2), %s231_s29, 4294967168  ;;  %s18_s14 = sadd.s32 1, %s493_s14   ;;  %s662_s9 = smov %s477_s10 }
  0xc4   : > { %p15_p3 = scmp.ge.s32.totalorder %s18_s14, 4   ;;  %s663_s10 = smov %s481_s11 }
  0xc5   : > { %s664_s11 = smov %s569_s23  ;;  %s665_s12 = smov %s489_s13 }
  0xc6   : > { %s666_s13 = smov %s668_s17  ;;  %17 = sbr.rel (!%p15_p3) target bundleno = 6 (0x6), region = 76 }
  0xcb   :  { %236 = vsyncpa [#allocation3], 1 }
  0xcc   :  { %238 = vsyncpa [#allocation3 + $0x1], 1 }
  0xcd   :  { %239 = vsyncpa [#allocation4], 1 }
  0xce   :  { %241 = vsyncpa [#allocation4 + $0x1], 1 }

</bundles_post_ra>
